<compile_context>
chip_gen: v5e
topology: v5e:2x2
jax: 0.10.0
libtpu: 0.0.40
codegen_flags: <defaults>
</compile_context>

<pallas_src>
import functools

import jax
import jax.numpy as jnp
from jax.experimental import pallas as pl
from jax.experimental.pallas import tpu as pltpu

_LANE_CANDIDATES = (4096, 2048, 1024, 512, 256, 128)  # lane-dense widths
_BLOCK_BYTES = 4 * 1024 * 1024        # ~4 MiB (f32) per x / out block
_MIN_GRID_STEPS = 8                   # keep the grid splittable across TCs
_VMEM_LIMIT_BYTES = 48 * 1024 * 1024  # < v7x's 64 MiB physical, >> scoped defaults


def _plan_layout(total: int):
    """Pick (lanes, rows-per-block, flat padding) for a lane-dense 2-D view."""
    lanes = None
    for cand in _LANE_CANDIDATES:
        if total % cand == 0:
            if lanes is None:
                lanes = cand                 # largest divisor as a fallback
            if total // cand >= 8:
                lanes = cand                 # prefer full 8-sublane utilisation
                break
    if lanes is None:
        # total not a multiple of 128 (rare for NCHW activations): pad the flat
        # view to the next lane boundary and slice the tail off afterwards.
        lanes = 128
    pad = (-total) % lanes
    m = (total + pad) // lanes
    if m <= 8:
        tm = m                               # single block == whole array
    else:
        tm_bytes = max(8, (_BLOCK_BYTES // (4 * lanes)) // 8 * 8)
        tm_split = max(8, (m // _MIN_GRID_STEPS) // 8 * 8)
        tm = min(tm_bytes, tm_split)
    return lanes, tm, pad


def _standard_normal(shape):
    """iid N(0,1) f32 drawn from the already-seeded on-core PRNG."""
    if hasattr(pltpu, "stateful_normal"):
        return pltpu.stateful_normal(shape, jnp.float32)

    # Older jax: Box-Muller transform of raw PRNG bits.
    def uniform01():
        bits = pltpu.prng_random_bits(shape)
        if bits.dtype != jnp.uint32:
            bits = pltpu.bitcast(bits, jnp.uint32)
        # mantissa trick: bits -> f32 in [1, 2), shift to [0, 1)
        return pltpu.bitcast((bits >> 9) | jnp.uint32(0x3F800000), jnp.float32) - 1.0

    u1, u2 = uniform01(), uniform01()
    r = jnp.sqrt(-2.0 * jnp.log(1.0 - u1))        # 1 - u1 in (0, 1]
    return r * jnp.cos((2.0 * jnp.pi) * u2)


def _noise_rng_kernel(seed_ref, params_ref, x_ref, o_ref):
    # Independent, deterministic stream per grid step (and per TensorCore).
    pltpu.prng_seed(seed_ref[0] + pl.program_id(0) * jnp.int32(1000003))
    n = _standard_normal(x_ref.shape)
    x = x_ref[...].astype(jnp.float32)
    # out = x + Q*2*(n - 0.5) == x + (2Q)*n + (-Q); params = [2Q, -Q]
    o_ref[...] = (x + params_ref[0] * n + params_ref[1]).astype(o_ref.dtype)


def _noise_ext_kernel(params_ref, x_ref, n_ref, o_ref):
    x = x_ref[...].astype(jnp.float32)
    o_ref[...] = (x + params_ref[0] * n_ref[...] + params_ref[1]).astype(o_ref.dtype)


@functools.partial(jax.jit, static_argnames=("lanes", "tm", "pad", "in_kernel_rng"))
def _noise_fwd(xb, key, params, *, lanes, tm, pad, in_kernel_rng):
    orig_shape, total = xb.shape, xb.size
    flat = xb.reshape(-1)
    if pad:
        flat = jnp.pad(flat, (0, pad))
    m = flat.size // lanes
    x2d = flat.reshape(m, lanes)

    block = pl.BlockSpec((tm, lanes), lambda i: (i, 0))
    smem = pl.BlockSpec(memory_space=pltpu.MemorySpace.SMEM)

    if in_kernel_rng:
        seed = jax.random.randint(key, (1,), 0, jnp.iinfo(jnp.int32).max,
                                  dtype=jnp.int32)
        kernel = _noise_rng_kernel
        in_specs = [smem, smem, block]
        operands = (seed, params, x2d)
    else:
        n2d = jax.random.normal(key, (m, lanes), dtype=jnp.float32)
        kernel = _noise_ext_kernel
        in_specs = [smem, block, block]
        operands = (params, x2d, n2d)

    out2d = pl.pallas_call(
        kernel,
        out_shape=jax.ShapeDtypeStruct((m, lanes), xb.dtype),
        grid=(pl.cdiv(m, tm),),
        in_specs=in_specs,
        out_specs=block,
        compiler_params=pltpu.CompilerParams(
            dimension_semantics=("parallel",),      # shard row tiles over TCs
            vmem_limit_bytes=_VMEM_LIMIT_BYTES,
        ),
    )(*operands)

    out = out2d.reshape(-1)
    if pad:
        out = out[:total]
    return out.reshape(orig_shape)


_IN_KERNEL_RNG = None   # None: untested; True/False: probed on first call


def noise_forward(xb: jax.Array, q, key: jax.Array) -> jax.Array:
    """Pallas TPU implementation of noise.forward: x + Q*2*(randn(x.shape) - 0.5)."""
    global _IN_KERNEL_RNG
    lanes, tm, pad = _plan_layout(xb.size)
    # [2Q, -Q] as a runtime SMEM operand: annealing Q never triggers a recompile.
    params = jnp.array([2.0 * float(q), -float(q)], dtype=jnp.float32)

    if _IN_KERNEL_RNG is not False:
        try:
            out = _noise_fwd(xb, key, params, lanes=lanes, tm=tm, pad=pad,
                             in_kernel_rng=True)
            if _IN_KERNEL_RNG is None:
                jax.block_until_ready(out)   # surface lowering errors exactly once
                _IN_KERNEL_RNG = True
            return out
        except Exception:
            _IN_KERNEL_RNG = False
    # TODO(synk): reached only if the on-core PRNG path fails to lower on this jax
    # build — stream externally generated N(0,1) noise instead (still correct,
    # but ~2x the HBM traffic of the in-kernel-PRNG path).
    return _noise_fwd(xb, key, params, lanes=lanes, tm=tm, pad=pad,
                      in_kernel_rng=False)


if __name__ == "__main__":
    Q = 0.1  # module hyperparameter (noise scale)

    root = jax.random.PRNGKey(0)
    k_x, k_n, k_n2 = jax.random.split(root, 3)
    xb = jax.random.normal(k_x, (2, 4, 16, 16), dtype=jnp.float32)   # NCHW

    out = jax.block_until_ready(noise_forward(xb, Q, k_n))

    assert out.shape == xb.shape and out.dtype == xb.dtype
    assert bool(jnp.isfinite(out).all())

    # Statistical check: out - x = 2Q*(n - 0.5) with n ~ N(0,1), so the recovered
    # n must have mean ~0 and std ~1 (2048 samples, ~7-sigma bounds).
    n_est = (out - xb) / (2.0 * Q) + 0.5
    assert abs(float(n_est.mean())) < 0.15
    assert 0.85 < float(n_est.std()) < 1.15

    # Same key -> bit-identical augmentation (deterministic per-block seeding).
    out_same = noise_forward(xb, Q, k_n)
    assert bool(jnp.array_equal(out, out_same))

    # Different key -> different noise.
    out_diff = noise_forward(xb, Q, k_n2)
    assert float(jnp.abs(out_diff - out).max()) > 1e-3

    # Same key, doubled Q -> noise exactly doubles (checks the SMEM [2Q,-Q] path,
    # with no recompile between the two Q values).
    out_2q = noise_forward(xb, 2.0 * Q, k_n)
    assert bool(jnp.allclose(out_2q - xb, 2.0 * (out - xb), atol=3e-5, rtol=1e-5))

    print("KERNEL_OK")
</pallas_src>

<mosaic_0001>
module attributes {stable_mosaic.version = 11 : i64} {
  func.func @_noise_rng_kernel(%arg0: i32, %arg1: memref<1xi32, #tpu.memory_space<smem>>, %arg2: memref<2xf32, #tpu.memory_space<smem>>, %arg3: memref<8x256xf32, #tpu.memory_space<vmem>>, %arg4: memref<8x256xf32, #tpu.memory_space<vmem>>) attributes {dimension_semantics = [#tpu.dimension_semantics<parallel>], iteration_bounds = array<i64: 1>, scalar_prefetch = 0 : i64, scratch_operands = 0 : i64, tpu.core_type = #tpu.core_type<tc>, window_params = [{transform_indices = @transform_0, window_bounds = array<i64: 1>}, {transform_indices = @transform_1, window_bounds = array<i64: 2>}, {transform_indices = @transform_2, window_bounds = array<i64: 8, 256>}, {transform_indices = @transform_3, window_bounds = array<i64: 8, 256>}]} {
    %c0 = arith.constant 0 : index
    %0 = memref.load %arg1[%c0] : memref<1xi32, #tpu.memory_space<smem>>
    %c1000003_i32 = arith.constant 1000003 : i32
    %1 = arith.muli %arg0, %c1000003_i32 : i32
    %2 = arith.addi %0, %1 : i32
    "tpu.prng_set_seed_32"(%2) : (i32) -> ()
    %c0_i32 = arith.constant 0 : i32
    %c0_i32_0 = arith.constant 0 : i32
    %cst = arith.constant -0.99999994 : f32
    %cst_1 = arith.constant 1.000000e+00 : f32
    %3 = vector.broadcast %cst : f32 to vector<1x1xf32>
    %4 = vector.broadcast %cst_1 : f32 to vector<1x1xf32>
    %5 = "tpu.prng_random_bits"() : () -> vector<8x256xi32>
    %c9_i32 = arith.constant 9 : i32
    %6 = vector.broadcast %c9_i32 : i32 to vector<8x256xi32>
    %7 = arith.shrui %5, %6 : vector<8x256xi32>
    %c1065353216_i32 = arith.constant 1065353216 : i32
    %8 = vector.broadcast %c1065353216_i32 : i32 to vector<8x256xi32>
    %9 = arith.ori %7, %8 : vector<8x256xi32>
    %10 = tpu.bitcast %9 : vector<8x256xi32> -> vector<8x256xf32>
    %cst_2 = arith.constant 1.000000e+00 : f32
    %11 = vector.broadcast %cst_2 : f32 to vector<8x256xf32>
    %12 = arith.subf %10, %11 : vector<8x256xf32>
    %13 = arith.subf %4, %3 : vector<1x1xf32>
    %14 = vector.broadcast %13 : vector<1x1xf32> to vector<8x256xf32>
    %15 = arith.mulf %12, %14 : vector<8x256xf32>
    %16 = vector.broadcast %3 : vector<1x1xf32> to vector<8x256xf32>
    %17 = arith.addf %15, %16 : vector<8x256xf32>
    %18 = vector.broadcast %3 : vector<1x1xf32> to vector<8x256xf32>
    %19 = arith.maximumf %18, %17 : vector<8x256xf32>
    %cst_3 = arith.constant 0.000000e+00 : f32
    %20 = vector.broadcast %cst_3 : f32 to vector<8x256xf32>
    %21 = arith.subf %20, %19 : vector<8x256xf32>
    %22 = arith.mulf %19, %21 : vector<8x256xf32>
    %23 = math.log1p %22 : vector<8x256xf32>
    %cst_4 = arith.constant 0.000000e+00 : f32
    %24 = vector.broadcast %cst_4 : f32 to vector<8x256xf32>
    %25 = arith.subf %24, %23 : vector<8x256xf32>
    %cst_5 = arith.constant 5.000000e+00 : f32
    %26 = vector.broadcast %cst_5 : f32 to vector<8x256xf32>
    %27 = arith.cmpf olt, %25, %26 : vector<8x256xf32>
    %cst_6 = arith.constant 2.500000e+00 : f32
    %28 = vector.broadcast %cst_6 : f32 to vector<8x256xf32>
    %29 = arith.subf %25, %28 : vector<8x256xf32>
    %30 = math.sqrt %25 : vector<8x256xf32>
    %cst_7 = arith.constant 3.000000e+00 : f32
    %31 = vector.broadcast %cst_7 : f32 to vector<8x256xf32>
    %32 = arith.subf %30, %31 : vector<8x256xf32>
    %33 = arith.select %27, %29, %32 : vector<8x256xi1>, vector<8x256xf32>
    %cst_8 = arith.constant 2.81022636E-8 : f32
    %cst_9 = arith.constant -2.00214257E-4 : f32
    %34 = vector.broadcast %cst_8 : f32 to vector<8x256xf32>
    %35 = vector.broadcast %cst_9 : f32 to vector<8x256xf32>
    %36 = arith.select %27, %34, %35 : vector<8x256xi1>, vector<8x256xf32>
    %cst_10 = arith.constant 3.43273939E-7 : f32
    %cst_11 = arith.constant 1.00950558E-4 : f32
    %37 = vector.broadcast %cst_10 : f32 to vector<8x256xf32>
    %38 = vector.broadcast %cst_11 : f32 to vector<8x256xf32>
    %39 = arith.select %27, %37, %38 : vector<8x256xi1>, vector<8x256xf32>
    %40 = arith.mulf %36, %33 : vector<8x256xf32>
    %41 = arith.addf %39, %40 : vector<8x256xf32>
    %cst_12 = arith.constant -3.5233877E-6 : f32
    %cst_13 = arith.constant 0.00134934322 : f32
    %42 = vector.broadcast %cst_12 : f32 to vector<8x256xf32>
    %43 = vector.broadcast %cst_13 : f32 to vector<8x256xf32>
    %44 = arith.select %27, %42, %43 : vector<8x256xi1>, vector<8x256xf32>
    %45 = arith.mulf %41, %33 : vector<8x256xf32>
    %46 = arith.addf %44, %45 : vector<8x256xf32>
    %cst_14 = arith.constant -4.39150654E-6 : f32
    %cst_15 = arith.constant -0.00367342844 : f32
    %47 = vector.broadcast %cst_14 : f32 to vector<8x256xf32>
    %48 = vector.broadcast %cst_15 : f32 to vector<8x256xf32>
    %49 = arith.select %27, %47, %48 : vector<8x256xi1>, vector<8x256xf32>
    %50 = arith.mulf %46, %33 : vector<8x256xf32>
    %51 = arith.addf %49, %50 : vector<8x256xf32>
    %cst_16 = arith.constant 2.1858087E-4 : f32
    %cst_17 = arith.constant 0.00573950773 : f32
    %52 = vector.broadcast %cst_16 : f32 to vector<8x256xf32>
    %53 = vector.broadcast %cst_17 : f32 to vector<8x256xf32>
    %54 = arith.select %27, %52, %53 : vector<8x256xi1>, vector<8x256xf32>
    %55 = arith.mulf %51, %33 : vector<8x256xf32>
    %56 = arith.addf %54, %55 : vector<8x256xf32>
    %cst_18 = arith.constant -0.00125372503 : f32
    %cst_19 = arith.constant -0.0076224613 : f32
    %57 = vector.broadcast %cst_18 : f32 to vector<8x256xf32>
    %58 = vector.broadcast %cst_19 : f32 to vector<8x256xf32>
    %59 = arith.select %27, %57, %58 : vector<8x256xi1>, vector<8x256xf32>
    %60 = arith.mulf %56, %33 : vector<8x256xf32>
    %61 = arith.addf %59, %60 : vector<8x256xf32>
    %cst_20 = arith.constant -0.00417768164 : f32
    %cst_21 = arith.constant 0.00943887047 : f32
    %62 = vector.broadcast %cst_20 : f32 to vector<8x256xf32>
    %63 = vector.broadcast %cst_21 : f32 to vector<8x256xf32>
    %64 = arith.select %27, %62, %63 : vector<8x256xi1>, vector<8x256xf32>
    %65 = arith.mulf %61, %33 : vector<8x256xf32>
    %66 = arith.addf %64, %65 : vector<8x256xf32>
    %cst_22 = arith.constant 0.246640727 : f32
    %cst_23 = arith.constant 1.00167406 : f32
    %67 = vector.broadcast %cst_22 : f32 to vector<8x256xf32>
    %68 = vector.broadcast %cst_23 : f32 to vector<8x256xf32>
    %69 = arith.select %27, %67, %68 : vector<8x256xi1>, vector<8x256xf32>
    %70 = arith.mulf %66, %33 : vector<8x256xf32>
    %71 = arith.addf %69, %70 : vector<8x256xf32>
    %cst_24 = arith.constant 1.50140941 : f32
    %cst_25 = arith.constant 2.83297682 : f32
    %72 = vector.broadcast %cst_24 : f32 to vector<8x256xf32>
    %73 = vector.broadcast %cst_25 : f32 to vector<8x256xf32>
    %74 = arith.select %27, %72, %73 : vector<8x256xi1>, vector<8x256xf32>
    %75 = arith.mulf %71, %33 : vector<8x256xf32>
    %76 = arith.addf %74, %75 : vector<8x256xf32>
    %77 = math.absf %19 : vector<8x256xf32>
    %cst_26 = arith.constant 1.000000e+00 : f32
    %78 = vector.broadcast %cst_26 : f32 to vector<8x256xf32>
    %79 = arith.cmpf oeq, %77, %78 : vector<8x256xf32>
    %cst_27 = arith.constant 0x7F800000 : f32
    %80 = vector.broadcast %cst_27 : f32 to vector<8x256xf32>
    %81 = arith.mulf %80, %19 : vector<8x256xf32>
    %82 = arith.mulf %76, %19 : vector<8x256xf32>
    %83 = arith.select %79, %81, %82 : vector<8x256xi1>, vector<8x256xf32>
    %cst_28 = arith.constant 1.41421354 : f32
    %84 = vector.broadcast %cst_28 : f32 to vector<8x256xf32>
    %85 = arith.mulf %84, %83 : vector<8x256xf32>
    %c0_29 = arith.constant 0 : index
    %c0_30 = arith.constant 0 : index
    %86 = vector.load %arg3[%c0_29, %c0_30] : memref<8x256xf32, #tpu.memory_space<vmem>>, vector<8x256xf32>
    %c0_31 = arith.constant 0 : index
    %87 = memref.load %arg2[%c0_31] : memref<2xf32, #tpu.memory_space<smem>>
    %88 = vector.broadcast %87 : f32 to vector<8x256xf32>
    %89 = arith.mulf %88, %85 : vector<8x256xf32>
    %90 = arith.addf %86, %89 : vector<8x256xf32>
    %c1 = arith.constant 1 : index
    %91 = memref.load %arg2[%c1] : memref<2xf32, #tpu.memory_space<smem>>
    %92 = vector.broadcast %91 : f32 to vector<8x256xf32>
    %93 = arith.addf %90, %92 : vector<8x256xf32>
    %c0_32 = arith.constant 0 : index
    %c0_33 = arith.constant 0 : index
    %94 = vector.load %arg4[%c0_32, %c0_33] : memref<8x256xf32, #tpu.memory_space<vmem>>, vector<8x256xf32>
    tpu.vector_store %arg4[%c0_32, %c0_33], %93 {strides = array<i32>} : memref<8x256xf32, #tpu.memory_space<vmem>>, vector<8x256xf32>,
    return
  }
  func.func @transform_0(%arg0: i32) -> i32 {
    %c0_i32 = arith.constant 0 : i32
    %c0_i32_0 = arith.constant 0 : i32
    return %c0_i32 : i32
  }
  func.func @transform_1(%arg0: i32) -> i32 {
    %c0_i32 = arith.constant 0 : i32
    %c0_i32_0 = arith.constant 0 : i32
    return %c0_i32 : i32
  }
  func.func @transform_2(%arg0: i32) -> (i32, i32) {
    %c0_i32 = arith.constant 0 : i32
    %c0_i32_0 = arith.constant 0 : i32
    return %arg0, %c0_i32 : i32, i32
  }
  func.func @transform_3(%arg0: i32) -> (i32, i32) {
    %c0_i32 = arith.constant 0 : i32
    %c0_i32_0 = arith.constant 0 : i32
    return %arg0, %c0_i32 : i32, i32
  }
}

module attributes {stable_mosaic.version = 11 : i64} {
  func.func @_noise_ext_kernel(%arg0: i32, %arg1: memref<2xf32, #tpu.memory_space<smem>>, %arg2: memref<8x256xf32, #tpu.memory_space<vmem>>, %arg3: memref<8x256xf32, #tpu.memory_space<vmem>>, %arg4: memref<8x256xf32, #tpu.memory_space<vmem>>) attributes {dimension_semantics = [#tpu.dimension_semantics<parallel>], iteration_bounds = array<i64: 1>, scalar_prefetch = 0 : i64, scratch_operands = 0 : i64, tpu.core_type = #tpu.core_type<tc>, window_params = [{transform_indices = @transform_0, window_bounds = array<i64: 2>}, {transform_indices = @transform_1, window_bounds = array<i64: 8, 256>}, {transform_indices = @transform_2, window_bounds = array<i64: 8, 256>}, {transform_indices = @transform_3, window_bounds = array<i64: 8, 256>}]} {
    %c0 = arith.constant 0 : index
    %c0_0 = arith.constant 0 : index
    %0 = vector.load %arg2[%c0, %c0_0] : memref<8x256xf32, #tpu.memory_space<vmem>>, vector<8x256xf32>
    %c0_1 = arith.constant 0 : index
    %1 = memref.load %arg1[%c0_1] : memref<2xf32, #tpu.memory_space<smem>>
    %c0_2 = arith.constant 0 : index
    %c0_3 = arith.constant 0 : index
    %2 = vector.load %arg3[%c0_2, %c0_3] : memref<8x256xf32, #tpu.memory_space<vmem>>, vector<8x256xf32>
    %3 = vector.broadcast %1 : f32 to vector<8x256xf32>
    %4 = arith.mulf %3, %2 : vector<8x256xf32>
    %5 = arith.addf %0, %4 : vector<8x256xf32>
    %c1 = arith.constant 1 : index
    %6 = memref.load %arg1[%c1] : memref<2xf32, #tpu.memory_space<smem>>
    %7 = vector.broadcast %6 : f32 to vector<8x256xf32>
    %8 = arith.addf %5, %7 : vector<8x256xf32>
    %c0_4 = arith.constant 0 : index
    %c0_5 = arith.constant 0 : index
    %9 = vector.load %arg4[%c0_4, %c0_5] : memref<8x256xf32, #tpu.memory_space<vmem>>, vector<8x256xf32>
    tpu.vector_store %arg4[%c0_4, %c0_5], %8 {strides = array<i32>} : memref<8x256xf32, #tpu.memory_space<vmem>>, vector<8x256xf32>,
    return
  }
  func.func @transform_0(%arg0: i32) -> i32 {
    %c0_i32 = arith.constant 0 : i32
    %c0_i32_0 = arith.constant 0 : i32
    return %c0_i32 : i32
  }
  func.func @transform_1(%arg0: i32) -> (i32, i32) {
    %c0_i32 = arith.constant 0 : i32
    %c0_i32_0 = arith.constant 0 : i32
    return %arg0, %c0_i32 : i32, i32
  }
  func.func @transform_2(%arg0: i32) -> (i32, i32) {
    %c0_i32 = arith.constant 0 : i32
    %c0_i32_0 = arith.constant 0 : i32
    return %arg0, %c0_i32 : i32, i32
  }
  func.func @transform_3(%arg0: i32) -> (i32, i32) {
    %c0_i32 = arith.constant 0 : i32
    %c0_i32_0 = arith.constant 0 : i32
    return %arg0, %c0_i32 : i32, i32
  }
}

</mosaic_0001>

<bundles_post_ra>
// kernel: _noise_fwd.1
= control target key start
LH: loop header
LB: loop body
LE: loop exit
PB: predicated region body
PF: predicated region fallthrough
CT: control target
= control target key end

     0   :  { %9 = vsyncpa [#allocation4], 0  ;;  %s345_s15 = smov [#allocation3]   ;;  %s486_s0 = inlined_call_operand.<no memory space> [shape: s32[1], index: 0, kind: input, shape index: {}]   ;;  %s487_s1 = inlined_call_operand.vmem [shape: f32[2], index: 1, kind: input, shape index: {}]   ;;  %s488_s2 = inlined_call_operand.vmem [shape: f32[8,256], index: 2, kind: input, shape index: {}]   ;;  %s489_s3 = inlined_call_operand.vmem [shape: f32[8,256], index: 3, kind: output, shape index: {}]  }
   0x1   :  { %s17_s14 = sshll.u32 %s487_s1, 4  ;;  %s18_s14 = int_to_ptr.vmem [resolvable:$true] %s17_s14 }
   0x2   :  { %20 = dma.vmem_to_smem %s18_s14, 16, %s345_s15, [#allocation4]  }
   0x3   :  { %343 = dma.done.wait [#allocation4], 16  }
   0x4   :  { %344 = vsyncadd [#allocation4], 4294967280 }
   0x5   :  { %27 = sfence }
   0x6   :  { %v31_v0 = vlaneseq  ;;  %v381_v1 = vstv %s486_s0  ;;  %s289_s0 = sld [smem:[#allocation3]] }
   0x7   :  { %v33_v17 = vxor.u32 %v381_v1, %v381_v1  ;;  %s312_s1 = sld [smem:[#allocation3 + $0x1]] }
   0x8   :  { %v35_v2 = vadd.s32 %v381_v1, %v31_v0 }
   0x9   :  { %v386_v22 = vxor.u32 466688986, %v33_v17 }
   0xa   :  { %v36_v3 = vadd.s32 %v35_v2, %v35_v2  ;;  %v37_v4 = vshll.u32 %v35_v2, 13  ;;  %v38_v5 = vshrl.u32 %v35_v2, 19 }
   0xc   :  { %v39_v6 = vor.u32 %v38_v5, %v37_v4 }
   0xe   :  { %v40_v7 = vxor.u32 %v39_v6, %v36_v3 }
  0x10   :  { %v41_v8 = vadd.s32 %v40_v7, %v36_v3  ;;  %v42_v9 = vshll.u32 %v40_v7, 15  ;;  %v43_v10 = vshrl.u32 %v40_v7, 17 }
  0x12   :  { %v44_v11 = vor.u32 %v43_v10, %v42_v9 }
  0x14   :  { %v45_v12 = vxor.u32 %v44_v11, %v41_v8 }
  0x16   :  { %v46_v13 = vadd.s32 %v45_v12, %v41_v8  ;;  %v47_v14 = vshll.u32 %v45_v12, 26  ;;  %v48_v15 = vshrl.u32 %v45_v12, 6 }
  0x18   :  { %v49_v16 = vor.u32 %v48_v15, %v47_v14 }
  0x1a   :  { %v50_v18 = vxor.u32 %v49_v16, %v46_v13 }
  0x1c   :  { %v51_v19 = vadd.s32 %v50_v18, %v46_v13  ;;  %v52_v20 = vshll.u32 %v50_v18, 6  ;;  %v53_v21 = vshrl.u32 %v50_v18, 26 }
  0x1e   :  { %v54_v23 = vor.u32 %v53_v21, %v52_v20  ;;  %v56_v25 = vadd.s32 %v51_v19, %v381_v1 }
  0x20   :  { %v55_v24 = vxor.u32 %v54_v23, %v51_v19 }
  0x22   :  { %v57_v26 = vadd.s32 %v55_v24, %v386_v22 }
  0x24   :  { %v58_v27 = vadd.s32 1, %v57_v26 }
  0x26   :  { %v59_v28 = vadd.s32 %v58_v27, %v56_v25  ;;  %v60_v29 = vshll.u32 %v58_v27, 17  ;;  %v61_v30 = vshrl.u32 %v58_v27, 15 }
  0x28   :  { %v62_v31 = vor.u32 %v61_v30, %v60_v29 }
  0x2a   :  { %v63_v32 = vxor.u32 %v62_v31, %v59_v28 }
  0x2c   :  { %v64_v33 = vadd.s32 %v63_v32, %v59_v28  ;;  %v65_v34 = vshll.u32 %v63_v32, 29  ;;  %v66_v35 = vshrl.u32 %v63_v32, 3 }
  0x2e   :  { %v67_v36 = vor.u32 %v66_v35, %v65_v34 }
  0x30   :  { %v68_v37 = vxor.u32 %v67_v36, %v64_v33 }
  0x32   :  { %v69_v38 = vadd.s32 %v68_v37, %v64_v33  ;;  %v70_v39 = vshll.u32 %v68_v37, 16  ;;  %v71_v40 = vshrl.u32 %v68_v37, 16 }
  0x34   :  { %v72_v41 = vor.u32 %v71_v40, %v70_v39 }
  0x36   :  { %v73_v42 = vxor.u32 %v72_v41, %v69_v38 }
  0x38   :  { %v74_v43 = vadd.s32 %v73_v42, %v69_v38  ;;  %v75_v44 = vshll.u32 %v73_v42, 24  ;;  %v76_v45 = vshrl.u32 %v73_v42, 8 }
  0x3a   :  { %v77_v46 = vor.u32 %v76_v45, %v75_v44  ;;  %v79_v48 = vadd.s32 %v74_v43, %v386_v22 }
  0x3c   :  { %v78_v47 = vxor.u32 %v77_v46, %v74_v43 }
  0x3e   :  { %v80_v49 = vadd.s32 %v78_v47, %v381_v1 }
  0x40   :  { %v81_v50 = vadd.s32 2, %v80_v49 }
  0x42   :  { %v82_v51 = vadd.s32 %v81_v50, %v79_v48  ;;  %v83_v52 = vshll.u32 %v81_v50, 13  ;;  %v84_v53 = vshrl.u32 %v81_v50, 19 }
  0x44   :  { %v85_v54 = vor.u32 %v84_v53, %v83_v52 }
  0x46   :  { %v86_v55 = vxor.u32 %v85_v54, %v82_v51 }
  0x48   :  { %v87_v56 = vadd.s32 %v86_v55, %v82_v51  ;;  %v88_v57 = vshll.u32 %v86_v55, 15  ;;  %v89_v58 = vshrl.u32 %v86_v55, 17 }
  0x4a   :  { %v90_v59 = vor.u32 %v89_v58, %v88_v57 }
  0x4c   :  { %v91_v60 = vxor.u32 %v90_v59, %v87_v56 }
  0x4e   :  { %v92_v61 = vadd.s32 %v91_v60, %v87_v56  ;;  %v93_v62 = vshll.u32 %v91_v60, 26  ;;  %v94_v63 = vshrl.u32 %v91_v60, 6 }
  0x50   :  { %v95_v0 = vor.u32 %v94_v63, %v93_v62 }
  0x52   :  { %v96_v2 = vxor.u32 %v95_v0, %v92_v61 }
  0x54   :  { %v97_v3 = vadd.s32 %v96_v2, %v92_v61  ;;  %v98_v4 = vshll.u32 %v96_v2, 6  ;;  %v99_v5 = vshrl.u32 %v96_v2, 26 }
  0x56   :  { %v100_v6 = vor.u32 %v99_v5, %v98_v4  ;;  %v102_v8 = vadd.s32 %v97_v3, %v381_v1 }
  0x58   :  { %v101_v7 = vxor.u32 %v100_v6, %v97_v3 }
  0x5a   :  { %v103_v9 = vadd.s32 %v101_v7, %v381_v1 }
  0x5c   :  { %v104_v10 = vadd.s32 3, %v103_v9 }
  0x5e   :  { %v105_v11 = vadd.s32 %v104_v10, %v102_v8  ;;  %v106_v12 = vshll.u32 %v104_v10, 17  ;;  %v107_v13 = vshrl.u32 %v104_v10, 15 }
  0x60   :  { %v108_v14 = vor.u32 %v107_v13, %v106_v12 }
  0x62   :  { %v109_v15 = vxor.u32 %v108_v14, %v105_v11 }
  0x64   :  { %v110_v16 = vadd.s32 %v109_v15, %v105_v11  ;;  %v111_v17 = vshll.u32 %v109_v15, 29  ;;  %v112_v18 = vshrl.u32 %v109_v15, 3 }
  0x66   :  { %v113_v19 = vor.u32 %v112_v18, %v111_v17 }
  0x68   :  { %v114_v20 = vxor.u32 %v113_v19, %v110_v16 }
  0x6a   :  { %v115_v21 = vadd.s32 %v114_v20, %v110_v16  ;;  %v116_v23 = vshll.u32 %v114_v20, 16  ;;  %v117_v24 = vshrl.u32 %v114_v20, 16 }
  0x6c   :  { %v118_v25 = vor.u32 %v117_v24, %v116_v23 }
  0x6e   :  { %v119_v26 = vxor.u32 %v118_v25, %v115_v21 }
  0x70   :  { %v120_v27 = vadd.s32 %v119_v26, %v115_v21  ;;  %v121_v28 = vshll.u32 %v119_v26, 24  ;;  %v122_v29 = vshrl.u32 %v119_v26, 8 }
  0x72   :  { %v123_v30 = vor.u32 %v122_v29, %v121_v28  ;;  %v125_v32 = vadd.s32 %v120_v27, %v381_v1 }
  0x74   :  { %v124_v31 = vxor.u32 %v123_v30, %v120_v27 }
  0x76   :  { %v126_v33 = vadd.s32 %v124_v31, %v386_v22 }
  0x78   :  { %v127_v34 = vadd.s32 4, %v126_v33 }
  0x7a   :  { %v128_v35 = vadd.s32 %v127_v34, %v125_v32  ;;  %v129_v36 = vshll.u32 %v127_v34, 13  ;;  %v130_v37 = vshrl.u32 %v127_v34, 19 }
  0x7c   :  { %v131_v38 = vor.u32 %v130_v37, %v129_v36 }
  0x7e   :  { %v132_v39 = vxor.u32 %v131_v38, %v128_v35 }
  0x80   :  { %v133_v40 = vadd.s32 %v132_v39, %v128_v35  ;;  %v134_v41 = vshll.u32 %v132_v39, 15  ;;  %v135_v42 = vshrl.u32 %v132_v39, 17 }
  0x82   :  { %v136_v43 = vor.u32 %v135_v42, %v134_v41 }
  0x84   :  { %v137_v44 = vxor.u32 %v136_v43, %v133_v40 }
  0x86   :  { %v138_v45 = vadd.s32 %v137_v44, %v133_v40  ;;  %v139_v46 = vshll.u32 %v137_v44, 26  ;;  %v140_v47 = vshrl.u32 %v137_v44, 6 }
  0x88   :  { %v141_v48 = vor.u32 %v140_v47, %v139_v46 }
  0x8a   :  { %v142_v49 = vxor.u32 %v141_v48, %v138_v45 }
  0x8c   :  { %v143_v50 = vadd.s32 %v142_v49, %v138_v45  ;;  %v144_v51 = vshll.u32 %v142_v49, 6  ;;  %v145_v52 = vshrl.u32 %v142_v49, 26 }
  0x8e   :  { %v146_v53 = vor.u32 %v145_v52, %v144_v51  ;;  %v148_v55 = vadd.s32 %v143_v50, %v386_v22 }
  0x90   :  { %v147_v54 = vxor.u32 %v146_v53, %v143_v50 }
  0x92   :  { %v149_v56 = vadd.s32 %v147_v54, %v381_v1 }
  0x94   :  { %v150_v57 = vadd.s32 5, %v149_v56  ;;  %v346_v56 = vmov -0.00020021426  }
  0x96   :  { %v151_v58 = vxor.u32 %v150_v57, %v148_v55 }
  0x98   :  { %152 = set.rngseed %v151_v58 }
  0x99   :  { %v153_v59 = vrng }
  0x9a   :  { %v154_v60 = vrng  ;;  %v155_v61 = vshrl.u32 %v153_v59, 9 }
  0x9b   :  { %v156_v62 = vshrl.u32 %v154_v60, 9 }
  0x9c   :  { %v157_v63 = vor.u32 1065353216, %v155_v61  ;;  %v347_v61 = vmov 0.00010095056  }
  0x9d   :  { %v158_v0 = vor.u32 1065353216, %v156_v62 }
  0x9e   :  { %v306_v2 = vadd.f32 -1.0, %v157_v63 }
  0x9f   :  { %v307_v3 = vadd.f32 -1.0, %v158_v0 }
  0xa0   :  { %v163_v4 = vmul.f32 2.0, %v306_v2 }
  0xa1   :  { %v164_v5 = vmul.f32 2.0, %v307_v3 }
  0xa2   :  { %v165_v6 = vadd.f32 -0.99999994, %v163_v4 }
  0xa3   :  { %v166_v7 = vadd.f32 -0.99999994, %v164_v5  ;;  %v348_v5 = vmov 0.0013493432  }
  0xa4   :  { %v398_v8 = vmax.f32 %v165_v6, -0.99999994 }
  0xa5   :  { %v400_v22 = vmax.f32 %v166_v7, -0.99999994 }
  0xa6   :  { %v169_v1 = vsub.f32 0.0, %v398_v8 }
  0xa7   :  { %v170_v9 = vsub.f32 0.0, %v400_v22 }
  0xa8   :  { %v171_v10 = vmul.f32 %v169_v1, %v398_v8 }
  0xa9   :  { %v172_v11 = vmul.f32 %v170_v9, %v400_v22 }
  0xaa   :  { %v173_v12 = vadd.f32 1.0, %v171_v10  ;;  %v176_v13 = vmul.f32 -0.5, %v171_v10  ;;  %v179_v17 = vand.u32 2147483647, %v171_v10 }
  0xab   :  { %v182_v14 = vadd.f32 1.0, %v172_v11  ;;  %v185_v15 = vmul.f32 -0.5, %v172_v11  ;;  %v188_v19 = vand.u32 2147483647, %v172_v11 }
  0xac   :  { %323 = vlog2.f32 %v173_v12  ;;  %v177_v16 = vadd.f32 1.0, %v176_v13  ;;  %vm180_vm0 = vcmp.lt.f32.partialorder %v179_v17, 0.0004427343  ;;  %v349_v12 = vmov -0.0036734284  }
  0xad   :  { %325 = vlog2.f32 %v182_v14  ;;  %v186_v18 = vadd.f32 1.0, %v185_v15  ;;  %vm189_vm1 = vcmp.lt.f32.partialorder %v188_v19, 0.0004427343  ;;  %v350_v19 = vmov 0.0057395077  }
  0xae   :  { %v178_v24 = vmul.f32 %v177_v16, %v171_v10 }
  0xaf   :  { %v187_v26 = vmul.f32 %v186_v18, %v172_v11 }
  0xb2   :  { %v324_v20 = vpop.eup %323 }
  0xb3   :  { %v326_v21 = vpop.eup %325  ;;  %v175_v23 = vmul.f32 0.6931472, %v324_v20 }
  0xb4   :  { %v184_v25 = vmul.f32 0.6931472, %v326_v21 }
  0xb5   :  { %v181_v27 = vsel %vm180_vm0, %v178_v24, %v175_v23 }
  0xb6   :  { %v190_v28 = vsel %vm189_vm1, %v187_v26, %v184_v25  ;;  %v406_v29 = vsub.f32 0.0, %v181_v27  ;;  %v351_v27 = vmov -0.0076224613  }
  0xb7   :  { %v408_v30 = vsub.f32 0.0, %v190_v28 }
  0xb8   :  { %327 = vrsqrt.f32 %v406_v29  ;;  %vm204_vm2 = vcmp.eq.f32.partialorder %v406_v29, inf  ;;  %v207_v44 = vand.u32 2147483648, %v406_v29  ;;  %vm206_vm3 = vcmp.eq.f32.partialorder %v406_v29, 0.0 }
  0xb9   :  { %329 = vrsqrt.f32 %v408_v30  ;;  %vm193_vm4 = vcmp.lt.f32.partialorder %v406_v29, 5.0  ;;  %vm216_vm5 = vcmp.eq.f32.partialorder %v408_v30, inf  ;;  %v219_v48 = vand.u32 2147483648, %v408_v30 }
  0xba   :  { %v308_v49 = vadd.f32 -2.5, %v406_v29  ;;  %vm218_vm6 = vcmp.eq.f32.partialorder %v408_v30, 0.0  ;;  %vm194_vm7 = vcmp.lt.f32.partialorder %v408_v30, 5.0  ;;  %v309_v53 = vadd.f32 -2.5, %v408_v30 }
  0xbb   :  { %v225_v57 = vsel %vm193_vm4, 2.8102264e-08, %v346_v56  ;;  %v226_v60 = vsel %vm194_vm7, 2.8102264e-08, %v346_v56  ;;  %v227_v62 = vsel %vm193_vm4, 3.4327394e-07, %v347_v61 }
  0xbc   :  { %v228_v2 = vsel %vm194_vm7, 3.4327394e-07, %v347_v61  ;;  %v233_v6 = vsel %vm193_vm4, -3.5233877e-06, %v348_v5  ;;  %v234_v9 = vsel %vm194_vm7, -3.5233877e-06, %v348_v5 }
  0xbd   :  { %v239_v13 = vsel %vm193_vm4, -4.3915065e-06, %v349_v12  ;;  %v240_v16 = vsel %vm194_vm7, -4.3915065e-06, %v349_v12  ;;  %v245_v20 = vsel %vm193_vm4, 0.00021858087, %v350_v19 }
  0xbe   :  { %v328_v31 = vpop.eup %327  ;;  %v246_v24 = vsel %vm194_vm7, 0.00021858087, %v350_v19  ;;  %v251_v28 = vsel %vm193_vm4, -0.001253725, %v351_v27 }
  0xbf   :  { %v198_v32 = vmul.f32 %v328_v31, %v406_v29  ;;  %v330_v33 = vpop.eup %329 }
  0xc0   :  { %v210_v35 = vmul.f32 %v330_v33, %v408_v30 }
  0xc1   :  { %v199_v34 = vmul.f32 %v328_v31, %v198_v32 }
  0xc2   :  { %v211_v37 = vmul.f32 %v330_v33, %v210_v35 }
  0xc3   :  { %v200_v36 = vmul.f32 0.5, %v199_v34 }
  0xc4   :  { %v212_v39 = vmul.f32 0.5, %v211_v37 }
  0xc5   :  { %v201_v38 = vsub.f32 1.5, %v200_v36  ;;  %v352_v36 = vmov 0.0094388705  }
  0xc6   :  { %v213_v41 = vsub.f32 1.5, %v212_v39  ;;  %v257_v37 = vsel %vm193_vm4, -0.0041776816, %v352_v36 }
  0xc7   :  { %v202_v40 = vmul.f32 %v328_v31, %v201_v38 }
  0xc8   :  { %v214_v43 = vmul.f32 %v330_v33, %v213_v41  ;;  %v252_v33 = vsel %vm194_vm7, -0.001253725, %v351_v27 }
  0xc9   :  { %v203_v42 = vmul.f32 %v202_v40, %v406_v29  ;;  %v258_v40 = vsel %vm194_vm7, -0.0041776816, %v352_v36 }
  0xca   :  { %v215_v46 = vmul.f32 %v214_v43, %v408_v30  ;;  %v353_v43 = vmov 1.001674  }
  0xcb   :  { %v205_v45 = vsel %vm204_vm2, %v406_v29, %v203_v42 }
  0xcc   :  { %v208_v47 = vsel %vm206_vm3, %v207_v44, %v205_v45  ;;  %v217_v50 = vsel %vm216_vm5, %v408_v30, %v215_v46  ;;  %v263_v44 = vsel %vm193_vm4, 0.24664073, %v353_v43  ;;  %v287_v30 = vld [vmem:[%s488_s2] sm:$0xff] }
  0xcd   :  { %v310_v51 = vadd.f32 -3.0, %v208_v47  ;;  %v220_v52 = vsel %vm218_vm6, %v219_v48, %v217_v50  ;;  %v264_v47 = vsel %vm194_vm7, 0.24664073, %v353_v43  ;;  %v354_v50 = vmov 2.8329768  }
  0xce   :  { %v311_v54 = vadd.f32 -3.0, %v220_v52  ;;  %v275_v52 = vand.u32 2147483647, %v398_v8  ;;  %v270_v56 = vsel %vm194_vm7, 1.5014094, %v354_v50 }
  0xcf   :  { %v223_v55 = vsel %vm193_vm4, %v308_v49, %v310_v51  ;;  %v269_v51 = vsel %vm193_vm4, 1.5014094, %v354_v50 }
  0xd0   :  { %v229_v58 = vmul.f32 %v225_v57, %v223_v55  ;;  %v224_v59 = vsel %vm194_vm7, %v309_v53, %v311_v54  ;;  %v276_v57 = vand.u32 2147483647, %v400_v22  ;;  %vm277_vm8 = vcmp.eq.f32.partialorder %v275_v52, 1.0 }
  0xd1   :  { %v230_v63 = vmul.f32 %v226_v60, %v224_v59  ;;  %v279_v60 = vmul.f32 inf, %v398_v8 }
  0xd2   :  { %v231_v0 = vadd.f32 %v229_v58, %v227_v62  ;;  %vm278_vm9 = vcmp.eq.f32.partialorder %v276_v57, 1.0 }
  0xd3   :  { %v232_v3 = vadd.f32 %v230_v63, %v228_v2  ;;  %v290_v63 = vstv %s289_s0 }
  0xd4   :  { %v235_v4 = vmul.f32 %v231_v0, %v223_v55 }
  0xd5   :  { %v236_v7 = vmul.f32 %v232_v3, %v224_v59 }
  0xd6   :  { %v237_v1 = vadd.f32 %v235_v4, %v233_v6  ;;  %v296_v4 = vstv %s312_s1 }
  0xd7   :  { %v238_v10 = vadd.f32 %v236_v7, %v234_v9 }
  0xd8   :  { %v241_v11 = vmul.f32 %v237_v1, %v223_v55 }
  0xd9   :  { %v242_v14 = vmul.f32 %v238_v10, %v224_v59 }
  0xda   :  { %v243_v15 = vadd.f32 %v241_v11, %v239_v13 }
  0xdb   :  { %v244_v17 = vadd.f32 %v242_v14, %v240_v16 }
  0xdc   :  { %v247_v18 = vmul.f32 %v243_v15, %v223_v55 }
  0xdd   :  { %v248_v21 = vmul.f32 %v244_v17, %v224_v59 }
  0xde   :  { %v249_v23 = vadd.f32 %v247_v18, %v245_v20 }
  0xdf   :  { %v250_v25 = vadd.f32 %v248_v21, %v246_v24 }
  0xe0   :  { %v253_v26 = vmul.f32 %v249_v23, %v223_v55 }
  0xe1   :  { %v254_v31 = vmul.f32 %v250_v25, %v224_v59 }
  0xe2   :  { %v255_v32 = vadd.f32 %v253_v26, %v251_v28 }
  0xe3   :  { %v256_v34 = vadd.f32 %v254_v31, %v252_v33 }
  0xe4   :  { %v259_v35 = vmul.f32 %v255_v32, %v223_v55 }
  0xe5   :  { %v260_v38 = vmul.f32 %v256_v34, %v224_v59 }
  0xe6   :  { %v261_v39 = vadd.f32 %v259_v35, %v257_v37 }
  0xe7   :  { %v262_v41 = vadd.f32 %v260_v38, %v258_v40 }
  0xe8   :  { %v265_v42 = vmul.f32 %v261_v39, %v223_v55 }
  0xe9   :  { %v266_v45 = vmul.f32 %v262_v41, %v224_v59 }
  0xea   :  { %v267_v46 = vadd.f32 %v265_v42, %v263_v44 }
  0xeb   :  { %v268_v48 = vadd.f32 %v266_v45, %v264_v47 }
  0xec   :  { %v271_v49 = vmul.f32 %v267_v46, %v223_v55  ;;  %v280_v55 = vmul.f32 inf, %v400_v22 }
  0xed   :  { %v272_v53 = vmul.f32 %v268_v48, %v224_v59 }
  0xee   :  { %v273_v54 = vadd.f32 %v271_v49, %v269_v51 }
  0xef   :  { %v274_v58 = vadd.f32 %v272_v53, %v270_v56 }
  0xf0   :  { %v281_v61 = vmul.f32 %v273_v54, %v398_v8  ;;  %v288_v8 = vld [vmem:[%s488_s2 + $0x8] sm:$0xff] }
  0xf1   :  { %v282_v29 = vmul.f32 %v274_v58, %v400_v22 }
  0xf2   :  { %v283_v62 = vsel %vm277_vm8, %v279_v60, %v281_v61 }
  0xf3   :  { %v285_v59 = vmul.f32 1.4142135, %v283_v62  ;;  %v284_v0 = vsel %vm278_vm9, %v280_v55, %v282_v29 }
  0xf4   :  { %v286_v2 = vmul.f32 1.4142135, %v284_v0 }
  0xf5   :  { %v291_v3 = vmul.f32 %v290_v63, %v285_v59 }
  0xf6   :  { %v292_v5 = vmul.f32 %v290_v63, %v286_v2 }
  0xf7   :  { %v293_v6 = vadd.f32 %v291_v3, %v287_v30 }
  0xf8   :  { %v294_v7 = vadd.f32 %v292_v5, %v288_v8 }
  0xf9   :  { %v297_v22 = vadd.f32 %v296_v4, %v293_v6 }
  0xfa   :  { %v298_v1 = vadd.f32 %v296_v4, %v294_v7 }
  0xfb   :  { %299 = vst [vmem:[%s489_s3] sm:$0xff] %v297_v22 }
  0xfc   :  { %300 = vst [vmem:[%s489_s3 + $0x8] sm:$0xff] %v298_v1 }
  0xfd   :  { %305 = vsyncpa [#allocation4], 1 }

// kernel: _noise_fwd.1
= control target key start
LH: loop header
LB: loop body
LE: loop exit
PB: predicated region body
PF: predicated region fallthrough
CT: control target
= control target key end

     0   :  { %8 = vsyncpa [#allocation3], 0  ;;  %s64_s15 = smov [#allocation2]   ;;  %s106_s0 = inlined_call_operand.vmem [shape: f32[2], index: 0, kind: input, shape index: {}]   ;;  %s107_s1 = inlined_call_operand.vmem [shape: f32[8,256], index: 1, kind: input, shape index: {}]   ;;  %s108_s2 = inlined_call_operand.vmem [shape: f32[8,256], index: 2, kind: input, shape index: {}]   ;;  %s109_s3 = inlined_call_operand.vmem [shape: f32[8,256], index: 3, kind: output, shape index: {}]  }
   0x1   :  { %s14_s14 = sshll.u32 %s106_s0, 4  ;;  %s15_s14 = int_to_ptr.vmem [resolvable:$true] %s14_s14 }
   0x2   :  { %17 = dma.vmem_to_smem %s15_s14, 16, %s64_s15, [#allocation3]  }
   0x3   :  { %62 = dma.done.wait [#allocation3], 16  }
   0x4   :  { %63 = vsyncadd [#allocation3], 4294967280 }
   0x5   :  { %26 = sfence }
   0x6   :  { %s29_s16 = sld [smem:[#allocation2]]  ;;  %v30_v0 = vld [vmem:[%s108_s2] sm:$0xff]  ;;  %v31_v1 = vld [vmem:[%s108_s2 + $0x8] sm:$0xff] }
   0x7   :  { %s48_s17 = sld [smem:[#allocation2 + $0x1]]  ;;  %v27_v2 = vld [vmem:[%s107_s1] sm:$0xff]  ;;  %v28_v4 = vld [vmem:[%s107_s1 + $0x8] sm:$0xff] }
   0xc   :  { %v32_v3 = vstv %s29_s16 }
   0xd   :  { %v33_v5 = vmul.f32 %v32_v3, %v30_v0  ;;  %v34_v6 = vmul.f32 %v32_v3, %v31_v1  ;;  %v38_v7 = vstv %s48_s17 }
   0xf   :  { %v35_v8 = vadd.f32 %v33_v5, %v27_v2  ;;  %v36_v9 = vadd.f32 %v34_v6, %v28_v4 }
  0x11   :  { %v39_v10 = vadd.f32 %v38_v7, %v35_v8  ;;  %v40_v11 = vadd.f32 %v38_v7, %v36_v9 }
  0x13   :  { %41 = vst [vmem:[%s109_s3] sm:$0xff] %v39_v10 }
  0x14   :  { %42 = vst [vmem:[%s109_s3 + $0x8] sm:$0xff] %v40_v11 }
  0x15   :  { %47 = vsyncpa [#allocation3], 1 }

</bundles_post_ra>
